<compile_context>
chip_gen: v7x
topology: tpu7x:2x2x1
jax: 0.10.0
libtpu: 0.0.40
codegen_flags: <defaults>
</compile_context>

<pallas_src>
import jax
import jax.numpy as jnp
import numpy as np
from jax.experimental import pallas as pl
from jax.experimental.pallas import tpu as pltpu


def _round_up(x, m):
    return ((x + m - 1) // m) * m


_FC_SLAB_BUDGET = 12 * 1024 * 1024   # streamed fc working-set cap (v7x-safe)


# ----------------------------------------------------------------------------
# Kernel 1: attention + GRU state update (single grid step)
# ----------------------------------------------------------------------------
def state_update_kernel(emb_ref, h_ref, enc_ref, esb_ref, aw_h_ref,
                        wx_e_ref, wx_c_ref, wh_ref, bx_ref, bh_ref,
                        hnew_ref, wgt_ref):
    emb = emb_ref[...]                       # (Bp, E)      f32
    h = h_ref[...]                           # (Bp, H)      f32
    enc = enc_ref[...]                       # (Bp, S, C2)  f32

    # Attention scores: tanh(h @ aw_h^T + enc @ aw_e^T + b); the h-independent
    # part (enc @ aw_e^T + b) arrives precomputed as esb.
    h_score = jnp.sum(h * aw_h_ref[...], axis=-1, keepdims=True)   # (Bp, 1)
    scores = jnp.tanh(esb_ref[...] + h_score)                      # (Bp, S)
    weighted = jnp.sum(enc * scores[:, :, None], axis=1)           # (Bp, C2)

    # GRU cell (gate order r, z, n), collapsed to 3 matmuls.  Each gate's
    # output is padded to Hp (multiple of 128) lanes so slices are aligned.
    wdt = wx_e_ref.dtype
    H = h.shape[1]
    Hp = wh_ref.shape[1] // 3

    gi = (jnp.dot(emb.astype(wdt), wx_e_ref[...],
                  preferred_element_type=jnp.float32)
          + jnp.dot(weighted.astype(wdt), wx_c_ref[...],
                    preferred_element_type=jnp.float32)
          + bx_ref[...])                                            # (Bp, 3Hp)
    gh = (jnp.dot(h.astype(wdt), wh_ref[...],
                  preferred_element_type=jnp.float32)
          + bh_ref[...])                                            # (Bp, 3Hp)

    r = jax.nn.sigmoid(gi[:, 0:H] + gh[:, 0:H])
    z = jax.nn.sigmoid(gi[:, Hp:Hp + H] + gh[:, Hp:Hp + H])
    n = jnp.tanh(gi[:, 2 * Hp:2 * Hp + H] + r * gh[:, 2 * Hp:2 * Hp + H])
    h_new = (1.0 - z) * n + z * h                                   # (Bp, H)

    hnew_ref[...] = h_new
    wgt_ref[...] = weighted


# ----------------------------------------------------------------------------
# Kernel 2: vocab projection -- one fused matmul per streamed, pre-tiled slab
# ----------------------------------------------------------------------------
def fc_kernel(act_ref, w_ref, logits_ref):
    # act: (Bp, Kp) resident; w_ref: (1, Kp, TN) contiguous pre-tiled slab.
    logits_ref[...] = jnp.dot(act_ref[...], w_ref[0],
                              preferred_element_type=jnp.float32)


# ----------------------------------------------------------------------------
# Parameter init (mirrors the PyTorch module's shapes)
# ----------------------------------------------------------------------------
def init_params(key, emb_dim, vocab_size, hidden_size, encoder_hidden_size):
    c2 = encoder_hidden_size * 2
    ks = jax.random.split(key, 10)

    def unif(k, shape, fan_in):
        s = 1.0 / np.sqrt(fan_in)
        return jax.random.uniform(k, shape, jnp.float32, -s, s)

    return dict(
        embedding=jax.random.normal(ks[0], (vocab_size, emb_dim), jnp.float32),
        # attn_fc: Linear(c2 + hidden, 1); runtime cat order = (h, enc)
        attn_w=unif(ks[1], (1, c2 + hidden_size), c2 + hidden_size),
        attn_b=unif(ks[2], (1,), c2 + hidden_size),
        # GRU(input = emb + c2, hidden) -- gate order (r, z, n)
        w_ih=unif(ks[3], (3 * hidden_size, emb_dim + c2), hidden_size),
        w_hh=unif(ks[4], (3 * hidden_size, hidden_size), hidden_size),
        b_ih=unif(ks[5], (3 * hidden_size,), hidden_size),
        b_hh=unif(ks[6], (3 * hidden_size,), hidden_size),
        # fc: Linear(c2 + hidden + emb, vocab); runtime cat = (h, weighted, emb)
        fc_w=unif(ks[7], (vocab_size, hidden_size + c2 + emb_dim),
                  hidden_size + c2 + emb_dim),
        fc_b=unif(ks[8], (vocab_size,), hidden_size + c2 + emb_dim),
    )


# ----------------------------------------------------------------------------
# fc tile sizing: biggest lane-dense TN that keeps the streamed working set
# under the budget (single tile when the whole projection fits).
# ----------------------------------------------------------------------------
def _fc_tiling(V, Kp, wbytes, Bp):
    def cost(tn, nbuf):
        return nbuf * Kp * tn * wbytes + 2 * Bp * tn * 4
    if cost(V, 1) <= _FC_SLAB_BUDGET:
        return V, 2                      # single grid step
    for tn in (2048, 1024, 512, 256, 128):
        if V % tn == 0 and cost(tn, 2) <= _FC_SLAB_BUDGET:
            return tn, (3 if cost(tn, 3) <= _FC_SLAB_BUDGET else 2)
    return V, 2                          # fall back: no tiling


def _state_vmem_limit(Bp, S, C2, E, H, Hp, wbytes):
    f32 = 4
    est = (Bp * (E + H + S * C2 + S) + H + 2 * 3 * Hp) * f32
    est += (E + C2 + H) * 3 * Hp * wbytes
    est += Bp * (H + C2) * f32
    return max(int(2.5 * est), 16 * 1024 * 1024)


def _fc_vmem_limit(Bp, Kp, TN, NT, nbuf, wbytes):
    bufs = max(nbuf, 2) if NT > 1 else 1
    est = 2 * Bp * Kp * wbytes + bufs * Kp * TN * wbytes + 2 * Bp * TN * 4
    return max(int(2 * est), 16 * 1024 * 1024)


# ----------------------------------------------------------------------------
# One-time weight preparation (hoisted out of the per-step decode path)
# ----------------------------------------------------------------------------
def prepare_decoder_params(params, emb_dim, hidden_size,
                           weight_dtype=jnp.bfloat16, max_batch=8):
    H, E = hidden_size, emb_dim
    wdt = weight_dtype
    wbytes = np.dtype(wdt).itemsize
    w_ih, w_hh = params["w_ih"], params["w_hh"]      # (3H, E+C2), (3H, H)
    b_ih, b_hh = params["b_ih"], params["b_hh"]
    aw = params["attn_w"]                            # (1, H + C2)
    fcw, fcb = params["fc_w"], params["fc_b"]        # (V, H+C2+E), (V,)
    C2 = aw.shape[1] - H
    V = fcw.shape[0]
    Hp = _round_up(H, 128)
    Bp = _round_up(max(max_batch, 1), 8)

    # GRU weights: per-gate blocks packed (lane-padded to Hp) into one slab per
    # input (embedded | context | hidden) so the kernel runs exactly 3 matmuls.
    def pack_w(w, rows):          # w: (3H, rows) -> (rows, 3Hp)
        out = jnp.zeros((rows, 3 * Hp), jnp.float32)
        for g in range(3):
            out = out.at[:, g * Hp:g * Hp + H].set(w[g * H:(g + 1) * H, :].T)
        return out.astype(wdt)

    def pack_b(b):                # (3H,) -> (1, 3Hp)  (stays f32)
        out = jnp.zeros((1, 3 * Hp), jnp.float32)
        for g in range(3):
            out = out.at[0, g * Hp:g * Hp + H].set(b[g * H:(g + 1) * H])
        return out

    # fc: fold bias in as an extra activation row (ones column), pad K, then
    # pre-tile over the vocab into contiguous (NT, Kp, TN) slabs.
    K = H + C2 + E
    Kp = _round_up(K + 1, 16)
    w_aug = jnp.zeros((Kp, V), jnp.float32)
    w_aug = w_aug.at[:K, :].set(fcw.T)
    w_aug = w_aug.at[K, :].set(fcb)
    TN, _ = _fc_tiling(V, Kp, wbytes, Bp)
    NT = V // TN
    fcw_tiled = w_aug.astype(wdt).reshape(Kp, NT, TN).transpose(1, 0, 2)

    return dict(
        embedding=params["embedding"],
        aw_h=aw[:, :H],                              # (1, H)
        aw_e=aw[:, H:],                              # (1, C2)
        attn_b=params["attn_b"].reshape(1, 1),
        gru_wx_e=pack_w(w_ih[:, :E], E),             # (E,  3Hp)
        gru_wx_c=pack_w(w_ih[:, E:], C2),            # (C2, 3Hp)
        gru_wh=pack_w(w_hh, H),                      # (H,  3Hp)
        gru_bx=pack_b(b_ih),                         # (1, 3Hp)
        gru_bh=pack_b(b_hh),                         # (1, 3Hp)
        fcw_tiled=fcw_tiled,                         # (NT, Kp, TN)
    )


def precompute_encoder_terms(encoder_outputs, prep):
    """Step-invariant attention term enc @ aw_e^T + b; once per sequence."""
    enc_bsd = jnp.transpose(encoder_outputs, (1, 0, 2))          # (B, S, C2)
    esb = jnp.sum(enc_bsd * prep["aw_e"][None, :, :], axis=-1) + prep["attn_b"]
    return enc_bsd, esb.astype(jnp.float32)                      # (B, S)


# ----------------------------------------------------------------------------
# Per-step wrapper
# ----------------------------------------------------------------------------
def decoder_step(x_ids, h, enc_bsd, esb, prep):
    """x_ids (B,1) int32, h (B,H), enc_bsd (B,S,C2), esb (B,S) -> logits, h_new."""
    B, H = h.shape
    _, S, C2 = enc_bsd.shape
    E = prep["gru_wx_e"].shape[0]
    NT, Kp, TN = prep["fcw_tiled"].shape
    V = NT * TN
    wdt = prep["fcw_tiled"].dtype
    wbytes = np.dtype(wdt).itemsize
    Hp = prep["gru_wh"].shape[1] // 3
    K = H + C2 + E

    # Embedding gather stays in plain JAX (dropout = identity in eval mode).
    emb = prep["embedding"][x_ids[:, 0].astype(jnp.int32)]          # (B, E)

    # Pad batch to a sublane multiple (8): full vregs, unmasked stores.
    Bp = _round_up(B, 8)
    if Bp != B:
        pad2 = ((0, Bp - B), (0, 0))
        emb_p = jnp.pad(emb, pad2)
        h_p = jnp.pad(h, pad2)
        enc_p = jnp.pad(enc_bsd, ((0, Bp - B), (0, 0), (0, 0)))
        esb_p = jnp.pad(esb, pad2)
    else:
        emb_p, h_p, enc_p, esb_p = emb, h, enc_bsd, esb

    # ---- Kernel 1: attention + GRU state update (runs once per step). ------
    def _full(shape):
        nd = len(shape)
        return pl.BlockSpec(shape, lambda i, _nd=nd: (0,) * _nd)

    state_spec = pltpu.PrefetchScalarGridSpec(
        num_scalar_prefetch=0,
        grid=(1,),
        in_specs=[_full((Bp, E)), _full((Bp, H)), _full((Bp, S, C2)),
                  _full((Bp, S)), _full((1, H)),
                  _full((E, 3 * Hp)), _full((C2, 3 * Hp)), _full((H, 3 * Hp)),
                  _full((1, 3 * Hp)), _full((1, 3 * Hp))],
        out_specs=(pl.BlockSpec((Bp, H), lambda i: (0, 0)),
                   pl.BlockSpec((Bp, C2), lambda i: (0, 0))),
    )
    h_new_p, weighted_p = pl.pallas_call(
        state_update_kernel,
        out_shape=(jax.ShapeDtypeStruct((Bp, H), jnp.float32),
                   jax.ShapeDtypeStruct((Bp, C2), jnp.float32)),
        grid_spec=state_spec,
        compiler_params=pltpu.CompilerParams(
            dimension_semantics=("arbitrary",),
            vmem_limit_bytes=_state_vmem_limit(Bp, S, C2, E, H, Hp, wbytes)),
    )(emb_p, h_p, enc_p, esb_p, prep["aw_h"],
      prep["gru_wx_e"], prep["gru_wx_c"], prep["gru_wh"],
      prep["gru_bx"], prep["gru_bh"])

    # fc activation: concat(h_new, weighted, emb, 1) with the bias folded in
    # via the ones column; padded to Kp and cast once to the weight dtype.
    ones = jnp.ones((Bp, 1), jnp.float32)
    act = jnp.concatenate([h_new_p, weighted_p, emb_p, ones], axis=1)
    act = jnp.pad(act, ((0, 0), (0, Kp - (K + 1)))).astype(wdt)     # (Bp, Kp)

    # ---- Kernel 2: vocab projection over pre-tiled contiguous fc slabs. ----
    nbuf = 3 if (NT > 1 and
                 3 * Kp * TN * wbytes + 2 * Bp * TN * 4 <= _FC_SLAB_BUDGET) else 2
    if NT > 1 and nbuf == 3:
        w_spec = pl.BlockSpec((1, Kp, TN), lambda j: (j, 0, 0),
                              pipeline_mode=pl.Buffered(3))
    else:
        w_spec = pl.BlockSpec((1, Kp, TN), lambda j: (j, 0, 0))

    fc_spec = pltpu.PrefetchScalarGridSpec(
        num_scalar_prefetch=0,
        grid=(NT,),
        in_specs=[pl.BlockSpec((Bp, Kp), lambda j: (0, 0)),   # act, resident
                  w_spec],                                    # streamed slabs
        out_specs=pl.BlockSpec((Bp, TN), lambda j: (0, j)),
    )
    logits_p = pl.pallas_call(
        fc_kernel,
        out_shape=jax.ShapeDtypeStruct((Bp, V), jnp.float32),
        grid_spec=fc_spec,
        compiler_params=pltpu.CompilerParams(
            # Independent vocab tiles: on v7x both TensorCores split the grid.
            dimension_semantics=("parallel",),
            vmem_limit_bytes=_fc_vmem_limit(Bp, Kp, TN, NT, nbuf, wbytes)),
    )(act, prep["fcw_tiled"])

    return logits_p[:B], h_new_p[:B]


# ----------------------------------------------------------------------------
# Pure-JAX reference mirroring the PyTorch forward exactly
# ----------------------------------------------------------------------------
def decoder_forward_ref(x_ids, h, encoder_outputs, params, H):
    emb = params["embedding"][x_ids[:, 0].astype(jnp.int32)]
    enc = jnp.transpose(encoder_outputs, (1, 0, 2))                 # (B, S, C2)
    S = enc.shape[1]
    h_rep = jnp.repeat(h[:, None, :], S, axis=1)
    cat = jnp.concatenate([h_rep, enc], axis=2)
    scores = jnp.tanh(cat @ params["attn_w"].T + params["attn_b"])  # (B, S, 1)
    weighted = jnp.einsum("bcs,bsk->bck",
                          jnp.transpose(enc, (0, 2, 1)), scores)[..., 0]
    gru_x = jnp.concatenate([emb, weighted], axis=1)
    gi = gru_x @ params["w_ih"].T + params["b_ih"]
    gh = h @ params["w_hh"].T + params["b_hh"]
    r = jax.nn.sigmoid(gi[:, :H] + gh[:, :H])
    z = jax.nn.sigmoid(gi[:, H:2 * H] + gh[:, H:2 * H])
    n = jnp.tanh(gi[:, 2 * H:] + r * gh[:, 2 * H:])
    h_new = (1.0 - z) * n + z * h
    fc_in = jnp.concatenate([h_new, weighted, emb], axis=1)
    logits = fc_in @ params["fc_w"].T + params["fc_b"]
    return logits, h_new


if __name__ == "__main__":
    emb_dim, vocab_size, hidden_size, encoder_hidden_size = 16, 1024, 32, 16
    batch, src_len = 4, 8
    C2 = encoder_hidden_size * 2

    key = jax.random.PRNGKey(0)
    k_par, k_x, k_h, k_enc = jax.random.split(key, 4)
    params = init_params(k_par, emb_dim, vocab_size, hidden_size,
                         encoder_hidden_size)

    x_ids = jax.random.randint(k_x, (batch, 1), 0, vocab_size, jnp.int32)
    h0 = jax.random.normal(k_h, (batch, hidden_size), jnp.float32)
    enc_out = jax.random.normal(k_enc, (src_len, batch, C2), jnp.float32)

    logits_ref, h_ref = decoder_forward_ref(x_ids, h0, enc_out, params,
                                            hidden_size)
    step = jax.jit(decoder_step)

    # f32 weight path (checks gate packing / fc fusion / bias folding exactly).
    prep32 = prepare_decoder_params(params, emb_dim, hidden_size,
                                    weight_dtype=jnp.float32, max_batch=batch)
    enc_bsd, esb = precompute_encoder_terms(enc_out, prep32)
    logits32, h32 = step(x_ids, h0, enc_bsd, esb, prep32)
    jax.block_until_ready((logits32, h32))
    np.testing.assert_allclose(np.asarray(logits32), np.asarray(logits_ref),
                               rtol=1e-2, atol=1e-2)
    np.testing.assert_allclose(np.asarray(h32), np.asarray(h_ref),
                               rtol=1e-2, atol=1e-2)

    # bf16 weight-streaming path (production config); looser tolerance since
    # GRU/fc weights and the fc activation are rounded to bfloat16.
    prep16 = prepare_decoder_params(params, emb_dim, hidden_size,
                                    weight_dtype=jnp.bfloat16, max_batch=batch)
    enc_bsd16, esb16 = precompute_encoder_terms(enc_out, prep16)
    logits16, h16 = step(x_ids, h0, enc_bsd16, esb16, prep16)
    jax.block_until_ready((logits16, h16))
    np.testing.assert_allclose(np.asarray(logits16), np.asarray(logits_ref),
                               rtol=5e-2, atol=5e-2)
    np.testing.assert_allclose(np.asarray(h16), np.asarray(h_ref),
                               rtol=5e-2, atol=5e-2)

    print("KERNEL_OK")
</pallas_src>

<mosaic_0001>
module attributes {stable_mosaic.version = 11 : i64} {
  func.func @state_update_kernel(%arg0: i32, %arg1: memref<8x16xf32, #tpu.memory_space<vmem>>, %arg2: memref<8x32xf32, #tpu.memory_space<vmem>>, %arg3: memref<8x8x32xf32, #tpu.memory_space<vmem>>, %arg4: memref<8x8xf32, #tpu.memory_space<vmem>>, %arg5: memref<1x32xf32, #tpu.memory_space<vmem>>, %arg6: memref<16x384xf32, #tpu.memory_space<vmem>>, %arg7: memref<32x384xf32, #tpu.memory_space<vmem>>, %arg8: memref<32x384xf32, #tpu.memory_space<vmem>>, %arg9: memref<1x384xf32, #tpu.memory_space<vmem>>, %arg10: memref<1x384xf32, #tpu.memory_space<vmem>>, %arg11: memref<8x32xf32, #tpu.memory_space<vmem>>, %arg12: memref<8x32xf32, #tpu.memory_space<vmem>>) attributes {dimension_semantics = [#tpu.dimension_semantics<arbitrary>], iteration_bounds = array<i64: 1>, scalar_prefetch = 0 : i64, scratch_operands = 0 : i64, tpu.core_type = #tpu.core_type<tc>, window_params = [{pipeline_mode = #tpu.pipeline_mode<synchronous>, transform_indices = @transform_0, window_bounds = array<i64: 8, 16>}, {pipeline_mode = #tpu.pipeline_mode<synchronous>, transform_indices = @transform_1, window_bounds = array<i64: 8, 32>}, {pipeline_mode = #tpu.pipeline_mode<synchronous>, transform_indices = @transform_2, window_bounds = array<i64: 8, 8, 32>}, {pipeline_mode = #tpu.pipeline_mode<synchronous>, transform_indices = @transform_3, window_bounds = array<i64: 8, 8>}, {pipeline_mode = #tpu.pipeline_mode<synchronous>, transform_indices = @transform_4, window_bounds = array<i64: 1, 32>}, {pipeline_mode = #tpu.pipeline_mode<synchronous>, transform_indices = @transform_5, window_bounds = array<i64: 16, 384>}, {pipeline_mode = #tpu.pipeline_mode<synchronous>, transform_indices = @transform_6, window_bounds = array<i64: 32, 384>}, {pipeline_mode = #tpu.pipeline_mode<synchronous>, transform_indices = @transform_7, window_bounds = array<i64: 32, 384>}, {pipeline_mode = #tpu.pipeline_mode<synchronous>, transform_indices = @transform_8, window_bounds = array<i64: 1, 384>}, {pipeline_mode = #tpu.pipeline_mode<synchronous>, transform_indices = @transform_9, window_bounds = array<i64: 1, 384>}, {pipeline_mode = #tpu.pipeline_mode<synchronous>, transform_indices = @transform_10, window_bounds = array<i64: 8, 32>}, {pipeline_mode = #tpu.pipeline_mode<synchronous>, transform_indices = @transform_11, window_bounds = array<i64: 8, 32>}]} {
    %c0 = arith.constant 0 : index
    %c0_0 = arith.constant 0 : index
    %0 = vector.load %arg1[%c0, %c0_0] : memref<8x16xf32, #tpu.memory_space<vmem>>, vector<8x16xf32>
    %c0_1 = arith.constant 0 : index
    %c0_2 = arith.constant 0 : index
    %1 = vector.load %arg2[%c0_1, %c0_2] : memref<8x32xf32, #tpu.memory_space<vmem>>, vector<8x32xf32>
    %c0_3 = arith.constant 0 : index
    %c0_4 = arith.constant 0 : index
    %c0_5 = arith.constant 0 : index
    %2 = vector.load %arg3[%c0_3, %c0_4, %c0_5] : memref<8x8x32xf32, #tpu.memory_space<vmem>>, vector<8x8x32xf32>
    %c0_6 = arith.constant 0 : index
    %c0_7 = arith.constant 0 : index
    %3 = vector.load %arg5[%c0_6, %c0_7] : memref<1x32xf32, #tpu.memory_space<vmem>>, vector<1x32xf32>
    %4 = vector.broadcast %3 : vector<1x32xf32> to vector<8x32xf32>
    %5 = arith.mulf %1, %4 : vector<8x32xf32>
    %cst = arith.constant dense<0.000000e+00> : vector<8xf32>
    %6 = vector.multi_reduction <add>, %5, %cst [1] : vector<8x32xf32> to vector<8xf32>
    %7 = vector.shape_cast %6 : vector<8xf32> to vector<8x1xf32>
    %c0_8 = arith.constant 0 : index
    %c0_9 = arith.constant 0 : index
    %8 = vector.load %arg4[%c0_8, %c0_9] : memref<8x8xf32, #tpu.memory_space<vmem>>, vector<8x8xf32>
    %9 = vector.broadcast %7 : vector<8x1xf32> to vector<8x8xf32>
    %10 = arith.addf %8, %9 : vector<8x8xf32>
    %11 = math.tanh %10 : vector<8x8xf32>
    %12 = vector.shape_cast %11 : vector<8x8xf32> to vector<8x8x1xf32>
    %13 = vector.broadcast %12 : vector<8x8x1xf32> to vector<8x8x32xf32>
    %14 = arith.mulf %2, %13 : vector<8x8x32xf32>
    %cst_10 = arith.constant dense<0.000000e+00> : vector<8x32xf32>
    %15 = vector.multi_reduction <add>, %14, %cst_10 [1] : vector<8x8x32xf32> to vector<8x32xf32>
    %c0_11 = arith.constant 0 : index
    %c0_12 = arith.constant 0 : index
    %16 = vector.load %arg6[%c0_11, %c0_12] : memref<16x384xf32, #tpu.memory_space<vmem>>, vector<16x384xf32>
    %cst_13 = arith.constant dense<0.000000e+00> : vector<8x384xf32>
    %17 = tpu.matmul %0, %16, %cst_13 {dimension_numbers = #tpu.dot_dimension_numbers<[1], [0], [0], [1], [0, 0, 1, 1], [], []>} : vector<8x16xf32>, vector<16x384xf32>, vector<8x384xf32> -> vector<8x384xf32>
    %c0_14 = arith.constant 0 : index
    %c0_15 = arith.constant 0 : index
    %18 = vector.load %arg7[%c0_14, %c0_15] : memref<32x384xf32, #tpu.memory_space<vmem>>, vector<32x384xf32>
    %cst_16 = arith.constant dense<0.000000e+00> : vector<8x384xf32>
    %19 = tpu.matmul %15, %18, %cst_16 {dimension_numbers = #tpu.dot_dimension_numbers<[1], [0], [0], [1], [0, 0, 1, 1], [], []>} : vector<8x32xf32>, vector<32x384xf32>, vector<8x384xf32> -> vector<8x384xf32>
    %20 = arith.addf %17, %19 : vector<8x384xf32>
    %c0_17 = arith.constant 0 : index
    %c0_18 = arith.constant 0 : index
    %21 = vector.load %arg9[%c0_17, %c0_18] : memref<1x384xf32, #tpu.memory_space<vmem>>, vector<1x384xf32>
    %22 = vector.broadcast %21 : vector<1x384xf32> to vector<8x384xf32>
    %23 = arith.addf %20, %22 : vector<8x384xf32>
    %c0_19 = arith.constant 0 : index
    %c0_20 = arith.constant 0 : index
    %24 = vector.load %arg8[%c0_19, %c0_20] : memref<32x384xf32, #tpu.memory_space<vmem>>, vector<32x384xf32>
    %cst_21 = arith.constant dense<0.000000e+00> : vector<8x384xf32>
    %25 = tpu.matmul %1, %24, %cst_21 {dimension_numbers = #tpu.dot_dimension_numbers<[1], [0], [0], [1], [0, 0, 1, 1], [], []>} : vector<8x32xf32>, vector<32x384xf32>, vector<8x384xf32> -> vector<8x384xf32>
    %c0_22 = arith.constant 0 : index
    %c0_23 = arith.constant 0 : index
    %26 = vector.load %arg10[%c0_22, %c0_23] : memref<1x384xf32, #tpu.memory_space<vmem>>, vector<1x384xf32>
    %27 = vector.broadcast %26 : vector<1x384xf32> to vector<8x384xf32>
    %28 = arith.addf %25, %27 : vector<8x384xf32>
    %29 = vector.extract_strided_slice %23 {offsets = [0, 0], sizes = [8, 32], strides = [1, 1]} : vector<8x384xf32> to vector<8x32xf32>
    %30 = vector.extract_strided_slice %28 {offsets = [0, 0], sizes = [8, 32], strides = [1, 1]} : vector<8x384xf32> to vector<8x32xf32>
    %31 = arith.addf %29, %30 : vector<8x32xf32>
    %32 = arith.negf %31 : vector<8x32xf32>
    %33 = math.exp %32 : vector<8x32xf32>
    %cst_24 = arith.constant 1.000000e+00 : f32
    %34 = vector.broadcast %cst_24 : f32 to vector<8x32xf32>
    %35 = arith.addf %34, %33 : vector<8x32xf32>
    %36 = arith.divf %34, %35 : vector<8x32xf32>
    %37 = vector.extract_strided_slice %23 {offsets = [0, 128], sizes = [8, 32], strides = [1, 1]} : vector<8x384xf32> to vector<8x32xf32>
    %38 = vector.extract_strided_slice %28 {offsets = [0, 128], sizes = [8, 32], strides = [1, 1]} : vector<8x384xf32> to vector<8x32xf32>
    %39 = arith.addf %37, %38 : vector<8x32xf32>
    %40 = arith.negf %39 : vector<8x32xf32>
    %41 = math.exp %40 : vector<8x32xf32>
    %cst_25 = arith.constant 1.000000e+00 : f32
    %42 = vector.broadcast %cst_25 : f32 to vector<8x32xf32>
    %43 = arith.addf %42, %41 : vector<8x32xf32>
    %44 = arith.divf %42, %43 : vector<8x32xf32>
    %45 = vector.extract_strided_slice %23 {offsets = [0, 256], sizes = [8, 32], strides = [1, 1]} : vector<8x384xf32> to vector<8x32xf32>
    %46 = vector.extract_strided_slice %28 {offsets = [0, 256], sizes = [8, 32], strides = [1, 1]} : vector<8x384xf32> to vector<8x32xf32>
    %47 = arith.mulf %36, %46 : vector<8x32xf32>
    %48 = arith.addf %45, %47 : vector<8x32xf32>
    %49 = math.tanh %48 : vector<8x32xf32>
    %cst_26 = arith.constant 1.000000e+00 : f32
    %50 = vector.broadcast %cst_26 : f32 to vector<8x32xf32>
    %51 = arith.subf %50, %44 : vector<8x32xf32>
    %52 = arith.mulf %51, %49 : vector<8x32xf32>
    %53 = arith.mulf %44, %1 : vector<8x32xf32>
    %54 = arith.addf %52, %53 : vector<8x32xf32>
    %c0_27 = arith.constant 0 : index
    %c0_28 = arith.constant 0 : index
    %55 = vector.load %arg11[%c0_27, %c0_28] : memref<8x32xf32, #tpu.memory_space<vmem>>, vector<8x32xf32>
    tpu.vector_store %arg11[%c0_27, %c0_28], %54 {strides = array<i32>} : memref<8x32xf32, #tpu.memory_space<vmem>>, vector<8x32xf32>,
    %c0_29 = arith.constant 0 : index
    %c0_30 = arith.constant 0 : index
    %56 = vector.load %arg12[%c0_29, %c0_30] : memref<8x32xf32, #tpu.memory_space<vmem>>, vector<8x32xf32>
    tpu.vector_store %arg12[%c0_29, %c0_30], %15 {strides = array<i32>} : memref<8x32xf32, #tpu.memory_space<vmem>>, vector<8x32xf32>,
    return
  }
  func.func @transform_0(%arg0: i32) -> (i32, i32) {
    %c0_i32 = arith.constant 0 : i32
    %c0_i32_0 = arith.constant 0 : i32
    %c0_i32_1 = arith.constant 0 : i32
    return %c0_i32, %c0_i32_0 : i32, i32
  }
  func.func @transform_1(%arg0: i32) -> (i32, i32) {
    %c0_i32 = arith.constant 0 : i32
    %c0_i32_0 = arith.constant 0 : i32
    %c0_i32_1 = arith.constant 0 : i32
    return %c0_i32, %c0_i32_0 : i32, i32
  }
  func.func @transform_2(%arg0: i32) -> (i32, i32, i32) {
    %c0_i32 = arith.constant 0 : i32
    %c0_i32_0 = arith.constant 0 : i32
    %c0_i32_1 = arith.constant 0 : i32
    %c0_i32_2 = arith.constant 0 : i32
    return %c0_i32, %c0_i32_0, %c0_i32_1 : i32, i32, i32
  }
  func.func @transform_3(%arg0: i32) -> (i32, i32) {
    %c0_i32 = arith.constant 0 : i32
    %c0_i32_0 = arith.constant 0 : i32
    %c0_i32_1 = arith.constant 0 : i32
    return %c0_i32, %c0_i32_0 : i32, i32
  }
  func.func @transform_4(%arg0: i32) -> (i32, i32) {
    %c0_i32 = arith.constant 0 : i32
    %c0_i32_0 = arith.constant 0 : i32
    %c0_i32_1 = arith.constant 0 : i32
    return %c0_i32, %c0_i32_0 : i32, i32
  }
  func.func @transform_5(%arg0: i32) -> (i32, i32) {
    %c0_i32 = arith.constant 0 : i32
    %c0_i32_0 = arith.constant 0 : i32
    %c0_i32_1 = arith.constant 0 : i32
    return %c0_i32, %c0_i32_0 : i32, i32
  }
  func.func @transform_6(%arg0: i32) -> (i32, i32) {
    %c0_i32 = arith.constant 0 : i32
    %c0_i32_0 = arith.constant 0 : i32
    %c0_i32_1 = arith.constant 0 : i32
    return %c0_i32, %c0_i32_0 : i32, i32
  }
  func.func @transform_7(%arg0: i32) -> (i32, i32) {
    %c0_i32 = arith.constant 0 : i32
    %c0_i32_0 = arith.constant 0 : i32
    %c0_i32_1 = arith.constant 0 : i32
    return %c0_i32, %c0_i32_0 : i32, i32
  }
  func.func @transform_8(%arg0: i32) -> (i32, i32) {
    %c0_i32 = arith.constant 0 : i32
    %c0_i32_0 = arith.constant 0 : i32
    %c0_i32_1 = arith.constant 0 : i32
    return %c0_i32, %c0_i32_0 : i32, i32
  }
  func.func @transform_9(%arg0: i32) -> (i32, i32) {
    %c0_i32 = arith.constant 0 : i32
    %c0_i32_0 = arith.constant 0 : i32
    %c0_i32_1 = arith.constant 0 : i32
    return %c0_i32, %c0_i32_0 : i32, i32
  }
  func.func @transform_10(%arg0: i32) -> (i32, i32) {
    %c0_i32 = arith.constant 0 : i32
    %c0_i32_0 = arith.constant 0 : i32
    %c0_i32_1 = arith.constant 0 : i32
    return %c0_i32, %c0_i32_0 : i32, i32
  }
  func.func @transform_11(%arg0: i32) -> (i32, i32) {
    %c0_i32 = arith.constant 0 : i32
    %c0_i32_0 = arith.constant 0 : i32
    %c0_i32_1 = arith.constant 0 : i32
    return %c0_i32, %c0_i32_0 : i32, i32
  }
}

module attributes {stable_mosaic.version = 11 : i64} {
  func.func @fc_kernel(%arg0: i32, %arg1: memref<8x96xf32, #tpu.memory_space<vmem>>, %arg2: memref<1x96x1024xf32, #tpu.memory_space<vmem>>, %arg3: memref<8x1024xf32, #tpu.memory_space<vmem>>) attributes {dimension_semantics = [#tpu.dimension_semantics<parallel>], iteration_bounds = array<i64: 1>, scalar_prefetch = 0 : i64, scratch_operands = 0 : i64, tpu.core_type = #tpu.core_type<tc>, window_params = [{pipeline_mode = #tpu.pipeline_mode<synchronous>, transform_indices = @transform_0, window_bounds = array<i64: 8, 96>}, {transform_indices = @transform_1, window_bounds = array<i64: 1, 96, 1024>}, {transform_indices = @transform_2, window_bounds = array<i64: 8, 1024>}]} {
    %c0 = arith.constant 0 : index
    %c0_0 = arith.constant 0 : index
    %0 = vector.load %arg1[%c0, %c0_0] : memref<8x96xf32, #tpu.memory_space<vmem>>, vector<8x96xf32>
    %c0_1 = arith.constant 0 : index
    %c0_2 = arith.constant 0 : index
    %c0_3 = arith.constant 0 : index
    %1 = vector.load %arg2[%c0_1, %c0_2, %c0_3] : memref<1x96x1024xf32, #tpu.memory_space<vmem>>, vector<1x96x1024xf32>
    %2 = vector.shape_cast %1 : vector<1x96x1024xf32> to vector<96x1024xf32>
    %cst = arith.constant dense<0.000000e+00> : vector<8x1024xf32>
    %3 = tpu.matmul %0, %2, %cst {dimension_numbers = #tpu.dot_dimension_numbers<[1], [0], [0], [1], [0, 0, 1, 1], [], []>} : vector<8x96xf32>, vector<96x1024xf32>, vector<8x1024xf32> -> vector<8x1024xf32>
    %c0_4 = arith.constant 0 : index
    %c0_5 = arith.constant 0 : index
    %4 = vector.load %arg3[%c0_4, %c0_5] : memref<8x1024xf32, #tpu.memory_space<vmem>>, vector<8x1024xf32>
    tpu.vector_store %arg3[%c0_4, %c0_5], %3 {strides = array<i32>} : memref<8x1024xf32, #tpu.memory_space<vmem>>, vector<8x1024xf32>,
    return
  }
  func.func @transform_0(%arg0: i32) -> (i32, i32) {
    %c0_i32 = arith.constant 0 : i32
    %c0_i32_0 = arith.constant 0 : i32
    %c0_i32_1 = arith.constant 0 : i32
    return %c0_i32, %c0_i32_0 : i32, i32
  }
  func.func @transform_1(%arg0: i32) -> (i32, i32, i32) {
    %c0_i32 = arith.constant 0 : i32
    %c0_i32_0 = arith.constant 0 : i32
    %c0_i32_1 = arith.constant 0 : i32
    return %arg0, %c0_i32, %c0_i32_0 : i32, i32, i32
  }
  func.func @transform_2(%arg0: i32) -> (i32, i32) {
    %c0_i32 = arith.constant 0 : i32
    %c0_i32_0 = arith.constant 0 : i32
    return %c0_i32, %arg0 : i32, i32
  }
}

</mosaic_0001>

<bundles_post_ra>
// kernel: decoder_step.2
= control target key start
LH: loop header
LB: loop body
LE: loop exit
PB: predicated region body
PF: predicated region fallthrough
CT: control target
= control target key end

     0   :  { %vm55_vm0 = vcmask 261120   ;;  %v62_v7 = vlaneseq  ;;  %v844_v34 = vmov 0.0|0.0   ;;  %v845_v45 = vmov 0.0   ;;  %s1097_s1 = inlined_call_operand.vmem [shape: f32[8,32], index: 1, kind: input, shape index: {}]   ;;  %s1098_s4 = inlined_call_operand.vmem [shape: f32[1,32], index: 4, kind: input, shape index: {}]   ;;  %s1099_s3 = inlined_call_operand.vmem [shape: f32[8,8], index: 3, kind: input, shape index: {}]   ;;  %s1100_s6 = inlined_call_operand.vmem [shape: f32[32,384], index: 6, kind: input, shape index: {}]   ;;  %s1101_s5 = inlined_call_operand.vmem [shape: f32[16,384], index: 5, kind: input, shape index: {}]   ;;  %s1102_s2 = inlined_call_operand.vmem [shape: f32[8,8,32], index: 2, kind: input, shape index: {}]   ;;  %s1103_s7 = inlined_call_operand.vmem [shape: f32[32,384], index: 7, kind: input, shape index: {}]   ;;  %s1104_s11 = inlined_call_operand.vmem [shape: f32[8,32], index: 11, kind: output, shape index: {1}]   ;;  %s1105_s0 = inlined_call_operand.vmem [shape: f32[8,16], index: 0, kind: input, shape index: {}]   ;;  %s1106_s9 = inlined_call_operand.vmem [shape: f32[1,384], index: 9, kind: input, shape index: {}]   ;;  %s1107_s8 = inlined_call_operand.vmem [shape: f32[1,384], index: 8, kind: input, shape index: {}]   ;;  %s1108_s10 = inlined_call_operand.vmem [shape: f32[8,32], index: 10, kind: output, shape index: {0}]  }
   0x1   :  { %v910_v0 = vld [vmem:[%s1097_s1] sm:$0xff]  ;;  %v189_v23 = vld [vmem:[%s1100_s6 + $0x8] sm:$0xff]  ;;  %v191_v29 = vld [vmem:[%s1100_s6 + $0x18] sm:$0xff]  ;;  %794 = vmatprep.subr.bf16.mxu1 %v844_v34  ;;  %288 = vmatprep.mubr.f32.mxu0 %v845_v45  ;;  %vm846_vm1 = vmmov 0   ;;  %vm208_vm2 = vcmask 1041409   ;;  %vm210_vm3 = vcmask 1042434  }
   0x2   :  { %v735_v1 = vld [vmem:[%s1098_s4] ss:$0 sm:$0xff]  ;;  %v63_v8 = vshrl.u32 %v62_v7, 7  ;;  %v190_v30 = vld [vmem:[%s1100_s6 + $0x10] sm:$0xff]  ;;  %v193_v32 = vld [vmem:[%s1100_s6 + $0x28] sm:$0xff]  ;;  %765 = vmatprep.mubr.msk.f32.mxu1 %vm846_vm1, %v845_v45  ;;  %vm212_vm4 = vcmask 1043459  }
   0x3   :  { %v54_v2 = vmul.f32 %v735_v1, %v910_v0  ;;  %v59_v4 = vld [vmem:[%s1099_s3] sm:$0xff]  ;;  %v795_v33 = vpack.c.bf16 %v193_v32, %v190_v30  ;;  %v195_v35 = vld [vmem:[%s1100_s6 + $0x38] sm:$0xff]  ;;  %v198_v36 = vld [vmem:[%s1100_s6 + $0x50] sm:$0xff]  ;;  %vm214_vm5 = vcmask 1044484   ;;  %vm216_vm6 = vcmask 1045509  }
   0x4   :  { %v920_v9 = vsub.s32 1, %v63_v8  ;;  %v922_v10 = vsub.s32 0, %v63_v8  ;;  %v926_v14 = vsub.s32 2, %v63_v8  ;;  %v85_v16 = vsub.s32 3, %v63_v8  ;;  %v192_v24 = vld [vmem:[%s1100_s6 + $0x20] sm:$0xff]  ;;  %v194_v39 = vld [vmem:[%s1100_s6 + $0x30] sm:$0xff] }
   0x5   :  { %v56_v3 = vsel %vm55_vm0, %v54_v2, 0.0  ;;  %v92_v18 = vsub.s32 4, %v63_v8  ;;  %v99_v20 = vsub.s32 5, %v63_v8  ;;  %v106_v22 = vsub.s32 6, %v63_v8  ;;  %v188_v28 = vld [vmem:[%s1100_s6] sm:$0xff]  ;;  %796 = vmatpush3.bf16.msra.mxu1 %v795_v33  ;;  %v197_v40 = vld [vmem:[%s1100_s6 + $0x48] sm:$0xff] }
   0x6   :  { %57 = vadd.xlane.f32.xlu0 %v56_v3  ;;  %v113_v26 = vsub.s32 7, %v63_v8  ;;  %v786_v27 = vpack.c.bf16 %v192_v24, %v189_v23  ;;  %v788_v31 = vpack.c.bf16 %v191_v29, %v188_v28  ;;  %v790_v38 = vpack.c.bf16 %v198_v36, %v195_v35  ;;  %v196_v41 = vld [vmem:[%s1100_s6 + $0x40] sm:$0xff]  ;;  %797 = vmatprep.subr.bf16.mxu1 %v844_v34  ;;  %v199_v43 = vld [vmem:[%s1100_s6 + $0x58] sm:$0xff]  ;;  %v183_v46 = vld [vmem:[%s1101_s5 + $0x8] sm:$0xff] }
   0x7   :  { %v792_v42 = vpack.c.bf16 %v197_v40, %v194_v39  ;;  %v798_v44 = vpack.c.bf16 %v199_v43, %v196_v41  ;;  %v186_v47 = vld [vmem:[%s1101_s5 + $0x20] sm:$0xff]  ;;  %v40_v49 = vld [vmem:[%s1102_s2 + $0x8] sm:$0xff]  ;;  %v41_v54 = vld [vmem:[%s1102_s2 + $0x10] sm:$0xff]  ;;  %vm218_vm7 = vcmask 1046534   ;;  %vm220_vm8 = vcmask 1047559  }
   0x8   :  { %787 = vmatprep.subr.bf16.mxu0 %v786_v27  ;;  %v800_v48 = vpack.c.bf16 %v186_v47, %v183_v46  ;;  %v39_v51 = vld [vmem:[%s1102_s2] sm:$0xff]  ;;  %v42_v59 = vld [vmem:[%s1102_s2 + $0x18] sm:$0xff]  ;;  %v45_v24 = vld [vmem:[%s1102_s2 + $0x30] sm:$0xff]  ;;  %vm365_vm9 = vcmask 130048  }
   0x9   :  { %789 = vmatpush1.bf16.msra.mxu0 %v788_v31  ;;  %799 = vmatpush3.bf16.msra.mxu1 %v798_v44  ;;  %v43_v3 = vld [vmem:[%s1102_s2 + $0x20] sm:$0xff]  ;;  %v46_v36 = vld [vmem:[%s1102_s2 + $0x38] sm:$0xff] }
   0xa   :  { %791 = vmatprep.subr.bf16.mxu0 %v790_v38  ;;  %804 = vmatprep.subr.bf16.mxu1 %v844_v34 }
   0xd   :  { %793 = vmatpush1.bf16.msra.mxu0 %v792_v42 }
   0xe   :  { %801 = vmatprep.subr.bf16.mxu0 %v800_v48 }
  0x93   :  { %v58_v5 = vpop.xlane.xlu0 %57 }
  0x94   :  { %v60_v6 = vadd.f32 %v59_v4, %v58_v5 }
  0x96   :  { %832 = vtanh.f32 %v60_v6 }
  0xa0   :  { %v833_v11 = vpop.eup %832 }
  0xa1   :  { %v72_v12 = vrot.slane %v833_v11, %v920_v9  ;;  %v65_v13 = vrot.slane %v833_v11, %v922_v10  ;;  %v79_v15 = vrot.slane %v833_v11, %v926_v14  ;;  %v86_v17 = vrot.slane %v833_v11, %v85_v16 }
  0xa2   :  { %v93_v19 = vrot.slane %v833_v11, %v92_v18  ;;  %v100_v21 = vrot.slane %v833_v11, %v99_v20  ;;  %v107_v25 = vrot.slane %v833_v11, %v106_v22  ;;  %v114_v37 = vrot.slane %v833_v11, %v113_v26 }
  0xa3   :  { %74 = vbcast.lane.b32.xlu1 %v72_v12, 256  ;;  %67 = vbcast.lane.b32.xlu0 %v65_v13, 256  ;;  %v44_v13 = vld [vmem:[%s1102_s2 + $0x28] sm:$0xff] }
  0xa7   :  { %81 = vbcast.lane.b32.xlu1 %v79_v15, 256 }
  0xab   :  { %88 = vbcast.lane.b32.xlu1 %v86_v17, 256 }
  0xaf   :  { %95 = vbcast.lane.b32.xlu1 %v93_v19, 256 }
  0xb3   :  { %102 = vbcast.lane.b32.xlu1 %v100_v21, 256 }
  0xb7   :  { %109 = vbcast.lane.b32.xlu1 %v107_v25, 256 }
  0xbb   :  { %116 = vbcast.lane.b32.xlu1 %v114_v37, 256 }
 0x115   :  { %v75_v50 = vpop.permute.xlu1 %74  ;;  %v68_v52 = vpop.permute.xlu0 %67 }
 0x116   :  { %v119_v53 = vmul.f32 %v75_v50, %v40_v49  ;;  %v118_v55 = vmul.f32 %v68_v52, %v39_v51 }
 0x118   :  { %v133_v58 = vsel %vm55_vm0, %v119_v53, 0.0  ;;  %v126_v60 = vsel %vm55_vm0, %v118_v55, 0.0 }
 0x119   :  { %v82_v56 = vpop.permute.xlu1 %81  ;;  %v134_v63 = vrot.slane %v133_v58, 4  ;;  %v127_v2 = vrot.slane %v126_v60, 4 }
 0x11a   :  { %v120_v57 = vmul.f32 %v82_v56, %v41_v54 }
 0x11b   :  { %v135_v8 = vadd.f32 %v134_v63, %v133_v58  ;;  %v128_v12 = vadd.f32 %v127_v2, %v126_v60 }
 0x11c   :  { %v140_v61 = vsel %vm55_vm0, %v120_v57, 0.0 }
 0x11d   :  { %v89_v62 = vpop.permute.xlu1 %88  ;;  %v141_v4 = vrot.slane %v140_v61, 4  ;;  %v136_v20 = vrot.slane %v135_v8, 2  ;;  %v129_v22 = vrot.slane %v128_v12, 2 }
 0x11e   :  { %v121_v1 = vmul.f32 %v89_v62, %v42_v59 }
 0x11f   :  { %v142_v15 = vadd.f32 %v141_v4, %v140_v61  ;;  %v137_v30 = vadd.f32 %v136_v20, %v135_v8  ;;  %v130_v33 = vadd.f32 %v129_v22, %v128_v12  ;;  %v185_v12 = vld [vmem:[%s1101_s5 + $0x18] sm:$0xff] }
 0x120   :  { %v147_v5 = vsel %vm55_vm0, %v121_v1, 0.0 }
 0x121   :  { %v148_v6 = vrot.slane %v147_v5, 4  ;;  %v96_v7 = vpop.permute.xlu1 %95  ;;  %v143_v25 = vrot.slane %v142_v15, 2  ;;  %v138_v43 = vrot.slane %v137_v30, 1  ;;  %v131_v47 = vrot.slane %v130_v33, 1 }
 0x122   :  { %v122_v11 = vmul.f32 %v96_v7, %v43_v3 }
 0x123   :  { %v149_v17 = vadd.f32 %v148_v6, %v147_v5  ;;  %v144_v37 = vadd.f32 %v143_v25, %v142_v15  ;;  %v139_v55 = vadd.f32 %v138_v43, %v137_v30  ;;  %v132_v57 = vadd.f32 %v131_v47, %v130_v33  ;;  %v184_v6 = vld [vmem:[%s1101_s5 + $0x10] sm:$0xff]  ;;  %v537_v33 = vld [vmem:[%s1103_s7 + $0x38] sm:$0xff] }
 0x124   :  { %v154_v16 = vsel %vm55_vm0, %v122_v11, 0.0  ;;  %v182_v11 = vld [vmem:[%s1101_s5] sm:$0xff]  ;;  %v532_v25 = vld [vmem:[%s1103_s7 + $0x10] sm:$0xff] }
 0x125   :  { %v155_v18 = vrot.slane %v154_v16, 4  ;;  %v103_v19 = vpop.permute.xlu1 %102  ;;  %v150_v27 = vrot.slane %v149_v17, 2  ;;  %v145_v50 = vrot.slane %v144_v37, 1  ;;  %v209_v3 = vsel %vm208_vm2, %v139_v55, %v132_v57 }
 0x126   :  { %v123_v21 = vmul.f32 %v103_v19, %v44_v13  ;;  %v187_v13 = vld [vmem:[%s1101_s5 + $0x28] sm:$0xff]  ;;  %v534_v19 = vld [vmem:[%s1103_s7 + $0x20] sm:$0xff]  ;;  %v802_v22 = vpack.c.bf16 %v185_v12, %v182_v11 }
 0x127   :  { %v156_v23 = vadd.f32 %v155_v18, %v154_v16  ;;  %v151_v39 = vadd.f32 %v150_v27, %v149_v17  ;;  %v146_v61 = vadd.f32 %v145_v50, %v144_v37  ;;  %v531_v18 = vld [vmem:[%s1103_s7 + $0x8] sm:$0xff]  ;;  %v541_v37 = vld [vmem:[%s1103_s7 + $0x58] sm:$0xff] }
 0x128   :  { %v161_v26 = vsel %vm55_vm0, %v123_v21, 0.0 }
 0x129   :  { %v162_v28 = vrot.slane %v161_v26, 4  ;;  %v110_v29 = vpop.permute.xlu1 %109  ;;  %v157_v31 = vrot.slane %v156_v23, 2  ;;  %v152_v52 = vrot.slane %v151_v39, 1  ;;  %v211_v7 = vsel %vm210_vm3, %v146_v61, %v209_v3 }
 0x12a   :  { %v124_v32 = vmul.f32 %v110_v29, %v45_v24  ;;  %v37_v29 = vld [vmem:[%s1105_s0] sm:$0xff] }
 0x12b   :  { %v163_v35 = vadd.f32 %v162_v28, %v161_v26  ;;  %v158_v44 = vadd.f32 %v157_v31, %v156_v23  ;;  %v153_v62 = vadd.f32 %v152_v52, %v151_v39  ;;  %v805_v23 = vpack.c.bf16 %v187_v13, %v184_v6  ;;  %v535_v26 = vld [vmem:[%s1103_s7 + $0x28] sm:$0xff]  ;;  %v530_v31 = vld [vmem:[%s1103_s7] sm:$0xff] }
 0x12c   :  { %v168_v38 = vsel %vm55_vm0, %v124_v32, 0.0  ;;  %v807_v28 = vpack.c.bf16 %v534_v19, %v531_v18  ;;  %v816_v30 = vpack.c.bf16 %v535_v26, %v532_v25  ;;  %v533_v32 = vld [vmem:[%s1103_s7 + $0x18] sm:$0xff] }
 0x12d   :  { %v164_v40 = vrot.slane %v163_v35, 2  ;;  %v169_v41 = vrot.slane %v168_v38, 4  ;;  %v117_v42 = vpop.permute.xlu1 %116  ;;  %v159_v56 = vrot.slane %v158_v44, 1  ;;  %v213_v15 = vsel %vm212_vm4, %v153_v62, %v211_v7 }
 0x12e   :  { %v125_v46 = vmul.f32 %v117_v42, %v46_v36  ;;  %v538_v36 = vld [vmem:[%s1103_s7 + $0x40] sm:$0xff] }
 0x12f   :  { %v165_v48 = vadd.f32 %v164_v40, %v163_v35  ;;  %v170_v49 = vadd.f32 %v169_v41, %v168_v38  ;;  %v160_v2 = vadd.f32 %v159_v56, %v158_v44  ;;  %v540_v35 = vld [vmem:[%s1103_s7 + $0x50] sm:$0xff]  ;;  %v809_v38 = vpack.c.bf16 %v533_v32, %v530_v31  ;;  %v539_v41 = vld [vmem:[%s1103_s7 + $0x48] sm:$0xff] }
 0x130   :  { %v175_v51 = vsel %vm55_vm0, %v125_v46, 0.0  ;;  %v811_v39 = vpack.c.bf16 %v540_v35, %v537_v33  ;;  %v536_v40 = vld [vmem:[%s1103_s7 + $0x30] sm:$0xff]  ;;  %v819_v42 = vpack.c.bf16 %v541_v37, %v538_v36 }
 0x131   :  { %v171_v53 = vrot.slane %v170_v49, 2  ;;  %v176_v54 = vrot.slane %v175_v51, 4  ;;  %v166_v58 = vrot.slane %v165_v48, 1  ;;  %v215_v17 = vsel %vm214_vm5, %v160_v2, %v213_v15 }
 0x132   :  { %v813_v43 = vpack.c.bf16 %v539_v41, %v536_v40 }
 0x133   :  { %v172_v59 = vadd.f32 %v171_v53, %v170_v49  ;;  %v177_v60 = vadd.f32 %v176_v54, %v175_v51  ;;  %v167_v4 = vadd.f32 %v166_v58, %v165_v48  ;;  %v542_v49 = vld [vmem:[%s1106_s9] sm:$0x7] }
 0x134   :  { %v547_v51 = vrot.slane %v542_v49, %v922_v10  ;;  %v551_v53 = vrot.slane %v542_v49, %v920_v9 }
 0x135   :  { %v173_v63 = vrot.slane %v172_v59, 1  ;;  %v178_v1 = vrot.slane %v177_v60, 2  ;;  %v217_v21 = vsel %vm216_vm6, %v167_v4, %v215_v17 }
 0x137   :  { %v179_v5 = vadd.f32 %v178_v1, %v177_v60  ;;  %v174_v8 = vadd.f32 %v173_v63, %v172_v59 }
 0x139   :  { %v180_v16 = vrot.slane %v179_v5, 1  ;;  %v219_v24 = vsel %vm218_vm7, %v174_v8, %v217_v21 }
 0x13b   :  { %v181_v20 = vadd.f32 %v180_v16, %v179_v5 }
 0x13d   :  { %v221_v27 = vsel %vm220_vm8, %v181_v20, %v219_v24 }
 0x13e   :  { %736 = vmatmul.mubr.msk.f32.vlgmr.msra.gmra.mrb[0].mxu0 %vm55_vm0, %v221_v27  ;;  %726 = vst.msk [vmem:[%s1104_s11] sm:$0xff] %vm55_vm0, %v221_v27  ;;  %766 = vmatmul.mubr.msk.f32.vlgmr.msra.gmra.mrb[0].mxu1 %vm55_vm0, %v221_v27 }
 0x13f   :  { %803 = vmatpush1.bf16.msra.mxu0 %v802_v22  ;;  %806 = vmatpush3.bf16.msra.mxu1 %v805_v23 }
 0x140   :  { %772 = vmatprep.mubr.msk.f32.mxu1 %vm846_vm1, %v845_v45  ;;  %433 = vmatprep.mubr.f32.mxu0 %v845_v45 }
 0x141   :  { %808 = vmatprep.subr.bf16.mxu0 %v807_v28  ;;  %815 = vmatprep.subr.bf16.mxu1 %v844_v34 }
 0x142   :  { %773 = vmatmul.mubr.msk.f32.vlgmr.msra.gmra.mrb[2].mxu1 %vm365_vm9, %v37_v29 }
 0x143   :  { %817 = vmatpush3.bf16.msra.mxu1 %v816_v30  ;;  %783 = vmatprep.mubr.msk.f32.mxu1 %vm846_vm1, %v845_v45 }
 0x144   :  { %818 = vmatprep.subr.bf16.mxu1 %v844_v34 }
 0x146   :  { %738 = vmatmul.mubr.msk.f32.vlgmr.msra.gmra.mrb[0].mxu0 %vm365_vm9, %v37_v29 }
 0x147   :  { %810 = vmatpush1.bf16.msra.mxu0 %v809_v38  ;;  %626 = vmatprep.mubr.f32.mxu0 %v845_v45  ;;  %v510_v45 = vld [vmem:[%s1107_s8] sm:$0x7] }
 0x148   :  { %812 = vmatprep.subr.bf16.mxu0 %v811_v39  ;;  %820 = vmatpush3.bf16.msra.mxu1 %v819_v42  ;;  %v515_v50 = vrot.slane %v510_v45, %v922_v10  ;;  %v519_v52 = vrot.slane %v510_v45, %v920_v9  ;;  %v555_v10 = vrot.slane %v542_v49, %v926_v14 }
 0x149   :  { %v523_v9 = vrot.slane %v510_v45, %v926_v14 }
 0x14a   :  { %v821_v54 = vadd.f32 %v547_v51, %v515_v50  ;;  %v823_v58 = vadd.f32 %v551_v53, %v519_v52 }
 0x14b   :  { %814 = vmatpush1.bf16.msra.mxu0 %v813_v43  ;;  %784 = vmatmul.mubr.msk.f32.vlgmr.msra.gmra.mrb[4].mxu1 %vm55_vm0, %v910_v0 }
 0x14e   :  { %740 = vmatmul.mubr.msk.f32.vlgmr.msra.gmra.mrb[0].mxu0 %vm55_vm0, %v910_v0 }
 0x211   :  { %v361_v44 = vpop.f32.mrb[0].mxu1 }
 0x212   :  { %v767_v46 = vpop.f32.mrb[1].mxu1 }
 0x215   :  { %v506_v47 = vpop.f32.mrb[2].mxu1 }
 0x216   :  { %v507_v34 = vadd.f32 %v506_v47, %v361_v44  ;;  %v774_v48 = vpop.f32.mrb[3].mxu1 }
 0x218   :  { %v529_v7 = vadd.f32 %v523_v9, %v507_v34 }
 0x21e   :  { %v699_v55 = vpop.f32.mrb[4].mxu1 }
 0x21f   :  { %v785_v56 = vpop.f32.mrb[5].mxu1  ;;  %v700_v5 = vadd.f32 %v699_v55, %v555_v10 }
 0x221   :  { %v628_v57 = vpop.f32.mrb[0].mxu0 }
 0x222   :  { %v822_v59 = vadd.f32 %v821_v54, %v628_v57  ;;  %v630_v60 = vpop.f32.mrb[1].mxu0 }
 0x223   :  { %v824_v62 = vadd.f32 %v823_v58, %v630_v60 }
 0x224   :  { %v742_v61 = vmul.f32 -1.442695, %v822_v59 }
 0x225   :  { %v743_v63 = vmul.f32 -1.442695, %v824_v62 }
 0x226   :  { %834 = vpow2.f32 %v742_v61 }
 0x227   :  { %836 = vpow2.f32 %v743_v63 }
 0x230   :  { %v835_v1 = vpop.eup %834 }
 0x231   :  { %v707_v2 = vadd.f32 1.0, %v835_v1  ;;  %v837_v3 = vpop.eup %836 }
 0x232   :  { %v714_v4 = vadd.f32 1.0, %v837_v3 }
 0x233   :  { %838 = vrcp.f32 %v707_v2 }
 0x234   :  { %840 = vrcp.f32 %v714_v4 }
 0x23d   :  { %v839_v6 = vpop.eup %838 }
 0x23e   :  { %v717_v8 = vmul.f32 %v839_v6, %v700_v5  ;;  %v841_v12 = vpop.eup %840 }
 0x23f   :  { %v720_v13 = vsub.f32 1.0, %v841_v12  ;;  %v722_v16 = vmul.f32 %v841_v12, %v910_v0 }
 0x240   :  { %v718_v11 = vadd.f32 %v717_v8, %v529_v7 }
 0x242   :  { %842 = vtanh.f32 %v718_v11 }
 0x24c   :  { %v843_v15 = vpop.eup %842 }
 0x24d   :  { %v721_v17 = vmul.f32 %v843_v15, %v720_v13 }
 0x24f   :  { %v723_v18 = vadd.f32 %v722_v16, %v721_v17 }
 0x251   :  { %724 = vst.msk [vmem:[%s1108_s10] sm:$0xff] %vm55_vm0, %v723_v18 }

// kernel: decoder_step.3
= control target key start
LH: loop header
LB: loop body
LE: loop exit
PB: predicated region body
PF: predicated region fallthrough
CT: control target
= control target key end

     0   :  { %v509_v3 = vmov 0.0   ;;  %vm108_vm0 = vcmask 785408   ;;  %s854_s1 = inlined_call_operand.vmem [shape: f32[1,96,1024], index: 1, kind: input, shape index: {}]   ;;  %s855_s0 = inlined_call_operand.vmem [shape: f32[8,96], index: 0, kind: input, shape index: {}]   ;;  %s856_s2 = inlined_call_operand.vmem [shape: f32[8,1024], index: 2, kind: output, shape index: {}]  }
   0x1   :  { %v13_v0 = vld [vmem:[%s854_s1 + $0x8] sm:$0xff]  ;;  %v15_v2 = vld [vmem:[%s854_s1 + $0x18] sm:$0xff]  ;;  %176 = vmatprep.mubr.f32.mxu0 %v509_v3  ;;  %247 = vmatprep.mubr.f32.mxu1 %v509_v3  ;;  %v12_v6 = vld [vmem:[%s854_s1] sm:$0xff] }
   0x2   :  { %v21_v1 = vld [vmem:[%s854_s1 + $0x48] sm:$0xff]  ;;  %v23_v5 = vld [vmem:[%s854_s1 + $0x58] sm:$0xff]  ;;  %v20_v7 = vld [vmem:[%s854_s1 + $0x40] sm:$0xff] }
   0x3   :  { %v412_v4 = vpack.c.bf16 %v21_v1, %v13_v0  ;;  %v436_v8 = vpack.c.bf16 %v23_v5, %v15_v2  ;;  %v414_v9 = vpack.c.bf16 %v20_v7, %v12_v6  ;;  %v14_v10 = vld [vmem:[%s854_s1 + $0x10] sm:$0xff]  ;;  %v29_v12 = vld [vmem:[%s854_s1 + $0x88] sm:$0xff]  ;;  %v31_v15 = vld [vmem:[%s854_s1 + $0x98] sm:$0xff] }
   0x4   :  { %v22_v11 = vld [vmem:[%s854_s1 + $0x50] sm:$0xff]  ;;  %v37_v14 = vld [vmem:[%s854_s1 + $0xc8] sm:$0xff]  ;;  %v39_v16 = vld [vmem:[%s854_s1 + $0xd8] sm:$0xff] }
   0x5   :  { %413 = vmatprep.subr.bf16.mxu0 %v412_v4  ;;  %v438_v13 = vpack.c.bf16 %v22_v11, %v14_v10  ;;  %437 = vmatprep.subr.bf16.mxu1 %v436_v8  ;;  %v416_v17 = vpack.c.bf16 %v37_v14, %v29_v12  ;;  %v440_v18 = vpack.c.bf16 %v39_v16, %v31_v15  ;;  %v28_v19 = vld [vmem:[%s854_s1 + $0x80] sm:$0xff]  ;;  %v30_v21 = vld [vmem:[%s854_s1 + $0x90] sm:$0xff]  ;;  %v45_v24 = vld [vmem:[%s854_s1 + $0x108] sm:$0xff] }
   0x6   :  { %415 = vmatpush1.bf16.msra.mxu0 %v414_v9  ;;  %v36_v20 = vld [vmem:[%s854_s1 + $0xc0] sm:$0xff]  ;;  %v38_v23 = vld [vmem:[%s854_s1 + $0xd0] sm:$0xff]  ;;  %v53_v25 = vld [vmem:[%s854_s1 + $0x148] sm:$0xff] }
   0x7   :  { %439 = vmatpush1.bf16.msra.mxu1 %v438_v13  ;;  %v418_v22 = vpack.c.bf16 %v36_v20, %v28_v19  ;;  %417 = vmatprep.subr.bf16.mxu0 %v416_v17  ;;  %v442_v26 = vpack.c.bf16 %v38_v23, %v30_v21  ;;  %v420_v27 = vpack.c.bf16 %v53_v25, %v45_v24  ;;  %v47_v28 = vld [vmem:[%s854_s1 + $0x118] sm:$0xff]  ;;  %v44_v30 = vld [vmem:[%s854_s1 + $0x100] sm:$0xff]  ;;  %v46_v33 = vld [vmem:[%s854_s1 + $0x110] sm:$0xff] }
   0x8   :  { %441 = vmatprep.subr.bf16.mxu1 %v440_v18  ;;  %v55_v29 = vld [vmem:[%s854_s1 + $0x158] sm:$0xff]  ;;  %v52_v32 = vld [vmem:[%s854_s1 + $0x140] sm:$0xff]  ;;  %v54_v34 = vld [vmem:[%s854_s1 + $0x150] sm:$0xff] }
   0x9   :  { %v444_v31 = vpack.c.bf16 %v55_v29, %v47_v28  ;;  %v422_v35 = vpack.c.bf16 %v52_v32, %v44_v30  ;;  %v61_v36 = vld [vmem:[%s854_s1 + $0x188] sm:$0xff]  ;;  %v63_v38 = vld [vmem:[%s854_s1 + $0x198] sm:$0xff]  ;;  %v446_v39 = vpack.c.bf16 %v54_v34, %v46_v33  ;;  %v60_v42 = vld [vmem:[%s854_s1 + $0x180] sm:$0xff] }
   0xa   :  { %419 = vmatpush1.bf16.msra.mxu0 %v418_v22  ;;  %v69_v37 = vld [vmem:[%s854_s1 + $0x1c8] sm:$0xff]  ;;  %v71_v41 = vld [vmem:[%s854_s1 + $0x1d8] sm:$0xff]  ;;  %v68_v43 = vld [vmem:[%s854_s1 + $0x1c0] sm:$0xff] }
   0xb   :  { %443 = vmatpush1.bf16.msra.mxu1 %v442_v26  ;;  %421 = vmatprep.subr.bf16.mxu0 %v420_v27  ;;  %v424_v40 = vpack.c.bf16 %v69_v37, %v61_v36  ;;  %v448_v44 = vpack.c.bf16 %v71_v41, %v63_v38  ;;  %v62_v45 = vld [vmem:[%s854_s1 + $0x190] sm:$0xff]  ;;  %v77_v47 = vld [vmem:[%s854_s1 + $0x208] sm:$0xff]  ;;  %v79_v49 = vld [vmem:[%s854_s1 + $0x218] sm:$0xff]  ;;  %v426_v51 = vpack.c.bf16 %v68_v43, %v60_v42 }
   0xc   :  { %445 = vmatprep.subr.bf16.mxu1 %v444_v31  ;;  %v70_v46 = vld [vmem:[%s854_s1 + $0x1d0] sm:$0xff]  ;;  %v85_v48 = vld [vmem:[%s854_s1 + $0x248] sm:$0xff]  ;;  %v87_v50 = vld [vmem:[%s854_s1 + $0x258] sm:$0xff] }
   0xd   :  { %v450_v52 = vpack.c.bf16 %v70_v46, %v62_v45  ;;  %v428_v53 = vpack.c.bf16 %v85_v48, %v77_v47  ;;  %v76_v54 = vld [vmem:[%s854_s1 + $0x200] sm:$0xff]  ;;  %v78_v56 = vld [vmem:[%s854_s1 + $0x210] sm:$0xff]  ;;  %v452_v57 = vpack.c.bf16 %v87_v50, %v79_v49  ;;  %v93_v59 = vld [vmem:[%s854_s1 + $0x288] sm:$0xff] }
   0xe   :  { %423 = vmatpush1.bf16.msra.mxu0 %v422_v35  ;;  %v84_v55 = vld [vmem:[%s854_s1 + $0x240] sm:$0xff]  ;;  %v86_v58 = vld [vmem:[%s854_s1 + $0x250] sm:$0xff]  ;;  %v101_v60 = vld [vmem:[%s854_s1 + $0x2c8] sm:$0xff] }
   0xf   :  { %447 = vmatpush1.bf16.msra.mxu1 %v446_v39  ;;  %425 = vmatprep.subr.bf16.mxu0 %v424_v40  ;;  %v95_v61 = vld [vmem:[%s854_s1 + $0x298] sm:$0xff]  ;;  %v430_v63 = vpack.c.bf16 %v84_v55, %v76_v54  ;;  %v454_v0 = vpack.c.bf16 %v86_v58, %v78_v56  ;;  %v432_v1 = vpack.c.bf16 %v101_v60, %v93_v59  ;;  %v92_v2 = vld [vmem:[%s854_s1 + $0x280] sm:$0xff]  ;;  %v94_v5 = vld [vmem:[%s854_s1 + $0x290] sm:$0xff] }
  0x10   :  { %449 = vmatprep.subr.bf16.mxu1 %v448_v44  ;;  %v103_v62 = vld [vmem:[%s854_s1 + $0x2d8] sm:$0xff]  ;;  %v100_v4 = vld [vmem:[%s854_s1 + $0x2c0] sm:$0xff]  ;;  %v102_v7 = vld [vmem:[%s854_s1 + $0x2d0] sm:$0xff] }
  0x11   :  { %v456_v6 = vpack.c.bf16 %v103_v62, %v95_v61  ;;  %v17_v8 = vld [vmem:[%s854_s1 + $0x28] sm:$0xff]  ;;  %v19_v10 = vld [vmem:[%s854_s1 + $0x38] sm:$0xff]  ;;  %v434_v12 = vpack.c.bf16 %v100_v4, %v92_v2  ;;  %v458_v13 = vpack.c.bf16 %v102_v7, %v94_v5  ;;  %v16_v15 = vld [vmem:[%s854_s1 + $0x20] sm:$0xff] }
  0x12   :  { %427 = vmatpush1.bf16.msra.mxu0 %v426_v51  ;;  %v25_v9 = vld [vmem:[%s854_s1 + $0x68] sm:$0xff]  ;;  %v27_v11 = vld [vmem:[%s854_s1 + $0x78] sm:$0xff]  ;;  %v24_v16 = vld [vmem:[%s854_s1 + $0x60] sm:$0xff] }
  0x13   :  { %451 = vmatpush1.bf16.msra.mxu1 %v450_v52  ;;  %429 = vmatprep.subr.bf16.mxu0 %v428_v53  ;;  %v460_v14 = vpack.c.bf16 %v25_v9, %v17_v8  ;;  %v18_v17 = vld [vmem:[%s854_s1 + $0x30] sm:$0xff]  ;;  %v484_v18 = vpack.c.bf16 %v27_v11, %v19_v10  ;;  %v33_v20 = vld [vmem:[%s854_s1 + $0xa8] sm:$0xff]  ;;  %v35_v22 = vld [vmem:[%s854_s1 + $0xb8] sm:$0xff]  ;;  %v462_v25 = vpack.c.bf16 %v24_v16, %v16_v15 }
  0x14   :  { %453 = vmatprep.subr.bf16.mxu1 %v452_v57  ;;  %v26_v19 = vld [vmem:[%s854_s1 + $0x70] sm:$0xff]  ;;  %v41_v21 = vld [vmem:[%s854_s1 + $0xe8] sm:$0xff]  ;;  %v43_v23 = vld [vmem:[%s854_s1 + $0xf8] sm:$0xff] }
  0x15   :  { %v710_v24 = vld [vmem:[%s855_s0] sm:$0xff]  ;;  %v486_v26 = vpack.c.bf16 %v26_v19, %v18_v17  ;;  %v464_v27 = vpack.c.bf16 %v41_v21, %v33_v20  ;;  %v34_v30 = vld [vmem:[%s854_s1 + $0xb0] sm:$0xff]  ;;  %v488_v31 = vpack.c.bf16 %v43_v23, %v35_v22  ;;  %v49_v33 = vld [vmem:[%s854_s1 + $0x128] sm:$0xff] }
  0x16   :  { %431 = vmatpush1.bf16.msra.mxu0 %v430_v63  ;;  %v32_v28 = vld [vmem:[%s854_s1 + $0xa0] sm:$0xff]  ;;  %v42_v32 = vld [vmem:[%s854_s1 + $0xf0] sm:$0xff]  ;;  %v57_v34 = vld [vmem:[%s854_s1 + $0x168] sm:$0xff] }
  0x17   :  { %455 = vmatpush1.bf16.msra.mxu1 %v454_v0  ;;  %433 = vmatprep.subr.bf16.mxu0 %v432_v1  ;;  %v40_v29 = vld [vmem:[%s854_s1 + $0xe0] sm:$0xff]  ;;  %v51_v35 = vld [vmem:[%s854_s1 + $0x138] sm:$0xff]  ;;  %v490_v38 = vpack.c.bf16 %v42_v32, %v34_v30  ;;  %v468_v39 = vpack.c.bf16 %v57_v34, %v49_v33  ;;  %v50_v42 = vld [vmem:[%s854_s1 + $0x130] sm:$0xff] }
  0x18   :  { %457 = vmatprep.subr.bf16.mxu1 %v456_v6  ;;  %v59_v36 = vld [vmem:[%s854_s1 + $0x178] sm:$0xff]  ;;  %v466_v37 = vpack.c.bf16 %v40_v29, %v32_v28  ;;  %v48_v40 = vld [vmem:[%s854_s1 + $0x120] sm:$0xff]  ;;  %v58_v44 = vld [vmem:[%s854_s1 + $0x170] sm:$0xff] }
  0x19   :  { %v56_v41 = vld [vmem:[%s854_s1 + $0x160] sm:$0xff]  ;;  %v492_v43 = vpack.c.bf16 %v59_v36, %v51_v35  ;;  %v65_v45 = vld [vmem:[%s854_s1 + $0x1a8] sm:$0xff]  ;;  %v67_v47 = vld [vmem:[%s854_s1 + $0x1b8] sm:$0xff]  ;;  %v494_v50 = vpack.c.bf16 %v58_v44, %v50_v42 }
  0x1a   :  { %435 = vmatpush1.bf16.msra.mxu0 %v434_v12  ;;  %v73_v46 = vld [vmem:[%s854_s1 + $0x1e8] sm:$0xff]  ;;  %v75_v48 = vld [vmem:[%s854_s1 + $0x1f8] sm:$0xff]  ;;  %v470_v49 = vpack.c.bf16 %v56_v41, %v48_v40  ;;  %v64_v52 = vld [vmem:[%s854_s1 + $0x1a0] sm:$0xff] }
  0x1b   :  { %459 = vmatpush1.bf16.msra.mxu1 %v458_v13  ;;  %461 = vmatprep.subr.bf16.mxu0 %v460_v14  ;;  %v472_v51 = vpack.c.bf16 %v73_v46, %v65_v45  ;;  %v72_v53 = vld [vmem:[%s854_s1 + $0x1e0] sm:$0xff]  ;;  %v66_v54 = vld [vmem:[%s854_s1 + $0x1b0] sm:$0xff]  ;;  %v81_v56 = vld [vmem:[%s854_s1 + $0x228] sm:$0xff] }
  0x1c   :  { %485 = vmatprep.subr.bf16.mxu1 %v484_v18  ;;  %v74_v55 = vld [vmem:[%s854_s1 + $0x1f0] sm:$0xff]  ;;  %v89_v57 = vld [vmem:[%s854_s1 + $0x268] sm:$0xff]  ;;  %v83_v58 = vld [vmem:[%s854_s1 + $0x238] sm:$0xff]  ;;  %v474_v60 = vpack.c.bf16 %v72_v53, %v64_v52 }
  0x1d   :  { %408 = vmatmul.mubr.msk.f32.vlgmr.msra.gmra.mrb[0].mxu0 %vm108_vm0, %v710_v24  ;;  %v91_v59 = vld [vmem:[%s854_s1 + $0x278] sm:$0xff]  ;;  %v498_v61 = vpack.c.bf16 %v74_v55, %v66_v54  ;;  %v476_v62 = vpack.c.bf16 %v89_v57, %v81_v56  ;;  %v80_v63 = vld [vmem:[%s854_s1 + $0x220] sm:$0xff]  ;;  %v82_v1 = vld [vmem:[%s854_s1 + $0x230] sm:$0xff] }
  0x1e   :  { %409 = vmatmul.mubr.msk.f32.vlgmr.msra.gmra.mrb[0].mxu1 %vm108_vm0, %v710_v24  ;;  %463 = vmatpush1.bf16.msra.mxu0 %v462_v25  ;;  %v88_v0 = vld [vmem:[%s854_s1 + $0x260] sm:$0xff]  ;;  %v500_v2 = vpack.c.bf16 %v91_v59, %v83_v58  ;;  %v90_v4 = vld [vmem:[%s854_s1 + $0x270] sm:$0xff]  ;;  %v97_v5 = vld [vmem:[%s854_s1 + $0x2a8] sm:$0xff] }
  0x1f   :  { %487 = vmatpush1.bf16.msra.mxu1 %v486_v26  ;;  %465 = vmatprep.subr.bf16.mxu0 %v464_v27  ;;  %v105_v6 = vld [vmem:[%s854_s1 + $0x2e8] sm:$0xff]  ;;  %v99_v7 = vld [vmem:[%s854_s1 + $0x2b8] sm:$0xff]  ;;  %v478_v9 = vpack.c.bf16 %v88_v0, %v80_v63  ;;  %v502_v10 = vpack.c.bf16 %v90_v4, %v82_v1  ;;  %v96_v12 = vld [vmem:[%s854_s1 + $0x2a0] sm:$0xff] }
  0x20   :  { %489 = vmatprep.subr.bf16.mxu1 %v488_v31  ;;  %318 = vmatprep.mubr.f32.mxu0 %v509_v3  ;;  %v107_v8 = vld [vmem:[%s854_s1 + $0x2f8] sm:$0xff]  ;;  %v480_v11 = vpack.c.bf16 %v105_v6, %v97_v5  ;;  %v104_v13 = vld [vmem:[%s854_s1 + $0x2e0] sm:$0xff]  ;;  %v98_v15 = vld [vmem:[%s854_s1 + $0x2b0] sm:$0xff] }
  0x21   :  { %389 = vmatprep.mubr.f32.mxu1 %v509_v3  ;;  %v496_v3 = vpack.c.bf16 %v75_v48, %v67_v47  ;;  %v504_v14 = vpack.c.bf16 %v107_v8, %v99_v7  ;;  %v106_v16 = vld [vmem:[%s854_s1 + $0x2f0] sm:$0xff]  ;;  %v482_v17 = vpack.c.bf16 %v104_v13, %v96_v12 }
  0x22   :  { %467 = vmatpush1.bf16.msra.mxu0 %v466_v37  ;;  %v506_v18 = vpack.c.bf16 %v106_v16, %v98_v15 }
  0x23   :  { %491 = vmatpush1.bf16.msra.mxu1 %v490_v38  ;;  %469 = vmatprep.subr.bf16.mxu0 %v468_v39 }
  0x24   :  { %493 = vmatprep.subr.bf16.mxu1 %v492_v43 }
  0x26   :  { %471 = vmatpush1.bf16.msra.mxu0 %v470_v49 }
  0x27   :  { %495 = vmatpush1.bf16.msra.mxu1 %v494_v50  ;;  %473 = vmatprep.subr.bf16.mxu0 %v472_v51 }
  0x28   :  { %497 = vmatprep.subr.bf16.mxu1 %v496_v3 }
  0x2a   :  { %475 = vmatpush1.bf16.msra.mxu0 %v474_v60 }
  0x2b   :  { %499 = vmatpush1.bf16.msra.mxu1 %v498_v61  ;;  %477 = vmatprep.subr.bf16.mxu0 %v476_v62 }
  0x2c   :  { %501 = vmatprep.subr.bf16.mxu1 %v500_v2 }
  0x2e   :  { %479 = vmatpush1.bf16.msra.mxu0 %v478_v9 }
  0x2f   :  { %503 = vmatpush1.bf16.msra.mxu1 %v502_v10  ;;  %481 = vmatprep.subr.bf16.mxu0 %v480_v11 }
  0x30   :  { %505 = vmatprep.subr.bf16.mxu1 %v504_v14 }
  0x32   :  { %483 = vmatpush1.bf16.msra.mxu0 %v482_v17 }
  0x33   :  { %507 = vmatpush1.bf16.msra.mxu1 %v506_v18 }
  0x35   :  { %410 = vmatmul.mubr.msk.f32.vlgmr.msra.gmra.mrb[2].mxu0 %vm108_vm0, %v710_v24 }
  0x36   :  { %411 = vmatmul.mubr.msk.f32.vlgmr.msra.gmra.mrb[2].mxu1 %vm108_vm0, %v710_v24 }
  0xf0   :  { %v178_v19 = vpop.f32.mrb[0].mxu0 }
  0xf1   :  { %396 = vst [vmem:[%s856_s2] sm:$0xff] %v178_v19  ;;  %v249_v20 = vpop.f32.mrb[0].mxu1  ;;  %v180_v21 = vpop.f32.mrb[1].mxu0 }
  0xf2   :  { %398 = vst [vmem:[%s856_s2 + $0x10] sm:$0xff] %v249_v20  ;;  %397 = vst [vmem:[%s856_s2 + $0x8] sm:$0xff] %v180_v21  ;;  %v251_v22 = vpop.f32.mrb[1].mxu1 }
  0xf3   :  { %399 = vst [vmem:[%s856_s2 + $0x18] sm:$0xff] %v251_v22 }
 0x108   :  { %v320_v23 = vpop.f32.mrb[2].mxu0 }
 0x109   :  { %400 = vst [vmem:[%s856_s2 + $0x20] sm:$0xff] %v320_v23  ;;  %v391_v24 = vpop.f32.mrb[2].mxu1  ;;  %v322_v25 = vpop.f32.mrb[3].mxu0 }
 0x10a   :  { %402 = vst [vmem:[%s856_s2 + $0x30] sm:$0xff] %v391_v24  ;;  %401 = vst [vmem:[%s856_s2 + $0x28] sm:$0xff] %v322_v25  ;;  %v393_v26 = vpop.f32.mrb[3].mxu1 }
 0x10b   :  { %403 = vst [vmem:[%s856_s2 + $0x38] sm:$0xff] %v393_v26 }

</bundles_post_ra>
